<compile_context>
chip_gen: v7x
topology: tpu7x:2x2x1
jax: 0.10.0
libtpu: 0.0.40
codegen_flags: <defaults>
</compile_context>

<pallas_src>
import jax
import jax.numpy as jnp
from jax import lax
from jax.experimental import pallas as pl
from jax.experimental.pallas import tpu as pltpu


# ----------------------------------------------------------------------------
# tile / padding selection
# ----------------------------------------------------------------------------
def _choose_tile_and_pad(hw, n, cap=2048):
    """Pick a lane-dense tile (multiple of 128) over the per-image spatial axis.

    H*W is padded per image up to a multiple of the chosen tile, so every grid
    block lives entirely inside one image (this lets kernel 2 write the final
    (N, OC, HW) layout directly).  Padding overhead is kept <= ~12.5%, and we
    keep >= 2 grid blocks when possible for v7x's two TensorCores.
    """
    hw128 = -(-hw // 128) * 128
    cap = max(128, min(cap, hw128))
    tm, hw_pad = 128, hw128
    t = 256
    while t <= cap:
        pad = -(-hw128 // t) * t
        if pad - hw128 <= hw128 // 8:       # bounded padding overhead
            tm, hw_pad = t, pad
        t += 128
    if n * (hw_pad // tm) < 2 and tm % 256 == 0:
        tm //= 2                            # ensure >= 2 blocks for megacore
    return tm, hw_pad


# ----------------------------------------------------------------------------
# Kernel 1: conv1 GEMM (bias-free) -> per-tile BN partial statistics
#   d (Cmid, TM) = W1t (Cmid, K) @ patches_t (K, TM)
#   outputs: per-tile sum / sum-of-squares over the lane (M) axis.
# ----------------------------------------------------------------------------
def _conv1_stats_kernel(pt_ref, w1t_ref, sum_ref, ssq_ref):
    d = jnp.dot(w1t_ref[...], pt_ref[...], preferred_element_type=jnp.float32)
    sum_ref[0] = jnp.sum(d, axis=1, keepdims=True)
    ssq_ref[0] = jnp.sum(d * d, axis=1, keepdims=True)


def conv1_batch_stats(patches_t, w1t, *, tm):
    K, Mp = patches_t.shape
    Cmid = w1t.shape[0]
    nt = Mp // tm
    return pl.pallas_call(
        _conv1_stats_kernel,
        out_shape=(
            jax.ShapeDtypeStruct((nt, Cmid, 1), jnp.float32),   # per-tile sum
            jax.ShapeDtypeStruct((nt, Cmid, 1), jnp.float32),   # per-tile sum of squares
        ),
        grid_spec=pltpu.PrefetchScalarGridSpec(
            num_scalar_prefetch=0,
            grid=(nt,),
            in_specs=[
                pl.BlockSpec((K, tm), lambda i: (0, i)),        # patches^T tile
                pl.BlockSpec((Cmid, K), lambda i: (0, 0)),      # W1^T (resident)
            ],
            out_specs=[
                pl.BlockSpec((1, Cmid, 1), lambda i: (i, 0, 0)),
                pl.BlockSpec((1, Cmid, 1), lambda i: (i, 0, 0)),
            ],
        ),
        # distinct output blocks per grid step -> safe to megacore-split
        compiler_params=pltpu.CompilerParams(dimension_semantics=("parallel",)),
    )(patches_t, w1t)


# ----------------------------------------------------------------------------
# Kernel 2: recompute conv1 GEMM + BN scale/shift + ReLU + 1x1 conv GEMM,
# writing the final (N, OC, HW_pad) layout directly (lane-dense stores).
# ----------------------------------------------------------------------------
def _fused_conv_kernel(pt_ref, w1t_ref, scale_ref, shift_ref, w2t_ref, b2_ref, out_ref):
    d = jnp.dot(w1t_ref[...], pt_ref[...], preferred_element_type=jnp.float32)
    h = jnp.maximum(d * scale_ref[...] + shift_ref[...], 0.0)
    out_ref[0] = jnp.dot(w2t_ref[...], h, preferred_element_type=jnp.float32) + b2_ref[...]


def bn_relu_conv2(patches_t, w1t, scale, shift, w2t, b2, *, n, hw_pad, tm):
    K, Mp = patches_t.shape
    Cmid = w1t.shape[0]
    OC = w2t.shape[0]
    cpn = hw_pad // tm          # tiles per image
    nt = Mp // tm               # == n * cpn
    return pl.pallas_call(
        _fused_conv_kernel,
        out_shape=jax.ShapeDtypeStruct((n, OC, hw_pad), jnp.float32),
        grid_spec=pltpu.PrefetchScalarGridSpec(
            num_scalar_prefetch=0,
            grid=(nt,),
            in_specs=[
                pl.BlockSpec((K, tm), lambda i: (0, i)),        # patches^T tile
                pl.BlockSpec((Cmid, K), lambda i: (0, 0)),      # W1^T
                pl.BlockSpec((Cmid, 1), lambda i: (0, 0)),      # BN scale
                pl.BlockSpec((Cmid, 1), lambda i: (0, 0)),      # BN shift
                pl.BlockSpec((OC, Cmid), lambda i: (0, 0)),     # W2^T
                pl.BlockSpec((OC, 1), lambda i: (0, 0)),        # b2
            ],
            out_specs=pl.BlockSpec(
                (1, OC, tm), lambda i: (i // cpn, 0, i % cpn)   # final layout, lane-dense
            ),
        ),
        compiler_params=pltpu.CompilerParams(dimension_semantics=("parallel",)),
    )(patches_t, w1t, scale, shift, w2t, b2)


# ----------------------------------------------------------------------------
# Full forward pass (glue in plain JAX, hot paths in Pallas)
# ----------------------------------------------------------------------------
def classification_forward(x_nchw, params, *, eps=1e-5):
    w1 = params["w1"].astype(jnp.float32)
    # NOTE: conv1's bias is a per-channel constant; training-mode BatchNorm
    # removes it exactly, so it is intentionally absent from both kernels.
    gamma = params["gamma"].astype(jnp.float32)
    beta = params["beta"].astype(jnp.float32)
    w2 = params["w2"].astype(jnp.float32)
    b2 = params["b2"].astype(jnp.float32)

    N, Cin, H, W = x_nchw.shape
    Cmid = w1.shape[0]          # 32
    OC = w2.shape[0]            # out_class
    HW = H * W
    K = 9 * Cin
    M = N * HW                  # number of real output positions

    tm, hw_pad = _choose_tile_and_pad(HW, N, cap=2048)

    # ---- channel-major im2col, built without a big-array transpose ----
    xp = jnp.pad(x_nchw.astype(jnp.float32), ((0, 0), (0, 0), (1, 1), (1, 1)))
    xt = jnp.transpose(xp, (1, 0, 2, 3))                  # (Cin, N, H+2, W+2): 1x-size transpose
    views = [xt[:, :, dh:dh + H, dw:dw + W] for dh in range(3) for dw in range(3)]
    patches = jnp.stack(views, axis=0)                    # (9, Cin, N, H, W)
    patches = patches.reshape(K, N, HW)
    if hw_pad > HW:
        patches = jnp.pad(patches, ((0, 0), (0, 0), (0, hw_pad - HW)))
    patches_t = patches.reshape(K, N * hw_pad)            # (K, N*hw_pad), K on sublanes
    # TODO(synk): build the 3x3 halo inside the kernels (9 shifted pl.ds slices
    # on a channel-major padded x tile) to avoid the 9x im2col in HBM.

    # conv1 weight (Cmid, Cin, 3, 3) -> (Cmid, kh, kw, Cin) -> (Cmid, K)
    w1t = jnp.transpose(w1, (0, 2, 3, 1)).reshape(Cmid, K)

    # ---- kernel 1: per-tile BN batch statistics of bias-free conv1 ----
    part_sum, part_ssq = conv1_batch_stats(patches_t, w1t, tm=tm)
    sum_d = jnp.sum(part_sum, axis=0)                     # (Cmid, 1)  tiny reduction
    ssq_d = jnp.sum(part_ssq, axis=0)                     # (Cmid, 1)
    mean_d = sum_d / M                                    # padded columns contribute 0
    var = ssq_d / M - mean_d * mean_d                     # biased var (PyTorch training fwd)
    scale = gamma.reshape(Cmid, 1) / jnp.sqrt(var + eps)
    shift = beta.reshape(Cmid, 1) - mean_d * scale        # bias-free form: b1 cancels in BN

    # conv2 (1x1) weight (OC, Cmid, 1, 1) -> (OC, Cmid)
    w2t = w2.reshape(OC, Cmid)

    # ---- kernel 2: recompute conv1 + BN + ReLU + 1x1 conv, final layout ----
    out3 = bn_relu_conv2(patches_t, w1t, scale, shift, w2t, b2.reshape(OC, 1),
                         n=N, hw_pad=hw_pad, tm=tm)       # (N, OC, hw_pad)
    out = out3[:, :, :HW].reshape(N, OC, H, W)            # slice off spatial padding
    return out


# ----------------------------------------------------------------------------
# Pure-JAX reference (for correctness check)
# ----------------------------------------------------------------------------
def reference_forward(x_nchw, params, *, eps=1e-5):
    w1, b1, gamma, beta, w2, b2 = (
        params["w1"], params["b1"], params["gamma"],
        params["beta"], params["w2"], params["b2"],
    )
    dn = lax.conv_dimension_numbers(x_nchw.shape, w1.shape, ("NCHW", "OIHW", "NCHW"))
    y = lax.conv_general_dilated(x_nchw, w1, (1, 1), ((1, 1), (1, 1)),
                                 dimension_numbers=dn) + b1[None, :, None, None]
    mean = jnp.mean(y, axis=(0, 2, 3), keepdims=True)
    var = jnp.mean((y - mean) ** 2, axis=(0, 2, 3), keepdims=True)
    y = (y - mean) / jnp.sqrt(var + eps)
    y = y * gamma[None, :, None, None] + beta[None, :, None, None]
    y = jnp.maximum(y, 0.0)
    dn2 = lax.conv_dimension_numbers(y.shape, w2.shape, ("NCHW", "OIHW", "NCHW"))
    out = lax.conv_general_dilated(y, w2, (1, 1), ((0, 0), (0, 0)),
                                   dimension_numbers=dn2) + b2[None, :, None, None]
    return out


if __name__ == "__main__":
    # Small shapes: batch=2, in_channels=4, spatial=16x16, out_class=20
    N, Cin, H, W = 2, 4, 16, 16
    Cmid, OC = 32, 20

    key = jax.random.PRNGKey(0)
    k0, k1, k2, k3, k4 = jax.random.split(key, 5)

    x = jax.random.normal(k0, (N, Cin, H, W), dtype=jnp.float32)

    params = {
        "w1": 0.1 * jax.random.normal(k1, (Cmid, Cin, 3, 3), dtype=jnp.float32),
        "b1": 0.05 * jax.random.normal(k2, (Cmid,), dtype=jnp.float32),
        "gamma": jnp.ones((Cmid,), dtype=jnp.float32),   # BatchNorm2d default weight
        "beta": jnp.zeros((Cmid,), dtype=jnp.float32),   # BatchNorm2d default bias
        "w2": 0.1 * jax.random.normal(k3, (OC, Cmid, 1, 1), dtype=jnp.float32),
        "b2": 0.05 * jax.random.normal(k4, (OC,), dtype=jnp.float32),
    }

    out = jax.block_until_ready(classification_forward(x, params))
    ref = jax.block_until_ready(reference_forward(x, params))

    assert out.shape == (N, OC, H, W), out.shape
    err = float(jnp.max(jnp.abs(out - ref)))
    assert jnp.allclose(out, ref, atol=1e-4, rtol=1e-4), err

    print("KERNEL_OK")
</pallas_src>

<mosaic_0001>
module attributes {stable_mosaic.version = 11 : i64} {
  func.func @_conv1_stats_kernel(%arg0: i32, %arg1: memref<36x256xf32, #tpu.memory_space<vmem>>, %arg2: memref<32x36xf32, #tpu.memory_space<vmem>>, %arg3: memref<1x32x1xf32, #tpu.memory_space<vmem>>, %arg4: memref<1x32x1xf32, #tpu.memory_space<vmem>>) attributes {dimension_semantics = [#tpu.dimension_semantics<parallel>], iteration_bounds = array<i64: 2>, scalar_prefetch = 0 : i64, scratch_operands = 0 : i64, tpu.core_type = #tpu.core_type<tc>, window_params = [{transform_indices = @transform_0, window_bounds = array<i64: 36, 256>}, {pipeline_mode = #tpu.pipeline_mode<synchronous>, transform_indices = @transform_1, window_bounds = array<i64: 32, 36>}, {transform_indices = @transform_2, window_bounds = array<i64: 1, 32, 1>}, {transform_indices = @transform_3, window_bounds = array<i64: 1, 32, 1>}]} {
    %c0 = arith.constant 0 : index
    %c0_0 = arith.constant 0 : index
    %0 = vector.load %arg2[%c0, %c0_0] : memref<32x36xf32, #tpu.memory_space<vmem>>, vector<32x36xf32>
    %c0_1 = arith.constant 0 : index
    %c0_2 = arith.constant 0 : index
    %1 = vector.load %arg1[%c0_1, %c0_2] : memref<36x256xf32, #tpu.memory_space<vmem>>, vector<36x256xf32>
    %cst = arith.constant dense<0.000000e+00> : vector<32x256xf32>
    %2 = tpu.matmul %0, %1, %cst {dimension_numbers = #tpu.dot_dimension_numbers<[1], [0], [0], [1], [0, 0, 1, 1], [], []>} : vector<32x36xf32>, vector<36x256xf32>, vector<32x256xf32> -> vector<32x256xf32>
    %cst_3 = arith.constant dense<0.000000e+00> : vector<32xf32>
    %3 = vector.multi_reduction <add>, %2, %cst_3 [1] : vector<32x256xf32> to vector<32xf32>
    %4 = vector.shape_cast %3 : vector<32xf32> to vector<32x1xf32>
    %c0_4 = arith.constant 0 : index
    %c0_5 = arith.constant 0 : index
    %c0_6 = arith.constant 0 : index
    %5 = vector.load %arg3[%c0_4, %c0_5, %c0_6] : memref<1x32x1xf32, #tpu.memory_space<vmem>>, vector<1x32x1xf32>
    %6 = vector.shape_cast %5 : vector<1x32x1xf32> to vector<32x1xf32>
    %7 = vector.shape_cast %4 : vector<32x1xf32> to vector<1x32x1xf32>
    tpu.vector_store %arg3[%c0_4, %c0_5, %c0_6], %7 {strides = array<i32>} : memref<1x32x1xf32, #tpu.memory_space<vmem>>, vector<1x32x1xf32>,
    %8 = arith.mulf %2, %2 : vector<32x256xf32>
    %cst_7 = arith.constant dense<0.000000e+00> : vector<32xf32>
    %9 = vector.multi_reduction <add>, %8, %cst_7 [1] : vector<32x256xf32> to vector<32xf32>
    %10 = vector.shape_cast %9 : vector<32xf32> to vector<32x1xf32>
    %c0_8 = arith.constant 0 : index
    %c0_9 = arith.constant 0 : index
    %c0_10 = arith.constant 0 : index
    %11 = vector.load %arg4[%c0_8, %c0_9, %c0_10] : memref<1x32x1xf32, #tpu.memory_space<vmem>>, vector<1x32x1xf32>
    %12 = vector.shape_cast %11 : vector<1x32x1xf32> to vector<32x1xf32>
    %13 = vector.shape_cast %10 : vector<32x1xf32> to vector<1x32x1xf32>
    tpu.vector_store %arg4[%c0_8, %c0_9, %c0_10], %13 {strides = array<i32>} : memref<1x32x1xf32, #tpu.memory_space<vmem>>, vector<1x32x1xf32>,
    return
  }
  func.func @transform_0(%arg0: i32) -> (i32, i32) {
    %c0_i32 = arith.constant 0 : i32
    %c0_i32_0 = arith.constant 0 : i32
    return %c0_i32, %arg0 : i32, i32
  }
  func.func @transform_1(%arg0: i32) -> (i32, i32) {
    %c0_i32 = arith.constant 0 : i32
    %c0_i32_0 = arith.constant 0 : i32
    %c0_i32_1 = arith.constant 0 : i32
    return %c0_i32, %c0_i32_0 : i32, i32
  }
  func.func @transform_2(%arg0: i32) -> (i32, i32, i32) {
    %c0_i32 = arith.constant 0 : i32
    %c0_i32_0 = arith.constant 0 : i32
    %c0_i32_1 = arith.constant 0 : i32
    return %arg0, %c0_i32, %c0_i32_0 : i32, i32, i32
  }
  func.func @transform_3(%arg0: i32) -> (i32, i32, i32) {
    %c0_i32 = arith.constant 0 : i32
    %c0_i32_0 = arith.constant 0 : i32
    %c0_i32_1 = arith.constant 0 : i32
    return %arg0, %c0_i32, %c0_i32_0 : i32, i32, i32
  }
}

</mosaic_0001>

<bundles_post_ra>
// kernel: tpu_custom_call.1
= control target key start
LH: loop header
LB: loop body
LE: loop exit
PB: predicated region body
PF: predicated region fallthrough
CT: control target
= control target key end

     0   :  { %9 = vsyncpa [#allocation3], 0  ;;  %s886_s0 = inlined_call_operand.hbm [shape: f32[36,512], index: 0, kind: input, shape index: {}]   ;;  %s887_s1 = inlined_call_operand.hbm [shape: f32[32,36], index: 1, kind: input, shape index: {}]   ;;  %s888_s2 = inlined_call_operand.vmem [shape: f32[2,32,1], index: 2, kind: output, shape index: {0}]   ;;  %s889_s3 = inlined_call_operand.vmem [shape: f32[2,32,1], index: 3, kind: output, shape index: {1}]  }
   0x1   :  { %11 = vsyncpa [#allocation3 + $0x1], 0 }
   0x2   :  { %12 = vsyncpa [#allocation5], 0  ;;  %s715_s12 = smov 0   ;;  %s717_s13 = smov 0  }
   0x3   :  { %s719_s14 = smov 0   ;;  %s721_s15 = smov 0  }
   0x4 LB: > { %s734_s16 = sadd.s32 4294967295, %s685_s15   ;;  %s737_s17 = sadd.s32 1, %s685_s15   ;;  %s685_s15 = sphi %s721_s15, %s907_s15   ;;  %s681_s14 = sphi %s719_s14, %s906_s14   ;;  %s677_s13 = sphi %s717_s13, %s905_s13   ;;  %s673_s12 = sphi %s715_s12, %s904_s12  }
   0x5   : > { %s22_s18 = ssub.s32 %s685_s15, %s737_s17  ;;  %s25_s19 = sadd.s32 1, %s681_s14 }
   0x6   : > { %p23_p0 = scmp.eq.s32.totalorder %s22_s18, 0  ;;  %p32_p1 = scmp.ne.s32.totalorder %s681_s14, %s677_s13 }
   0x7   : > { %p33_p2 = scmp.eq.s32.totalorder %s685_s15, 0  ;;  %p38_p3 = scmp.ne.s32.totalorder %s677_s13, %s673_s12 }
   0x8   : > { %s747_s20 = scalar_select %p23_p0, %s681_s14, %s25_s19  }
   0x9   : > { %p749_p4 = por %p33_p2, %p32_p1  ;;  %p890_p5 = scmp.eq.s32.totalorder %s734_s16, 0 }
   0xa   : > { %p495_p6 = scmp.ge.s32.totalorder %s685_s15, 1  ;;  %p122_p7 = scmp.lt.s32.totalorder %s685_s15, 3 }
   0xb   : > { %p758_p8 = por %p890_p5, %p38_p3  ;;  %s687_s24 = smov [#allocation4]  }
   0xc   : > { %p762_p9 = pnand %p495_p6, %p122_p7  ;;  %s134_s25 = sshll.u32 %s687_s24, 4  ;;  %s135_s25 = int_to_ptr.vmem [resolvable:$true] %s134_s25 }
   0xd   : > { %s895_s22 = scalar_select %p758_p8, 1, 0 }
   0xe   : > { %s896_s23 = scalar_select %p762_p9, 1, 0 }
   0xf   : > { %p539_p10 = pneg %p762_p9  ;;  %p548_p12 = scmp.lt.s32.totalorder %s685_s15, 2 }
  0x10   : > { %s148_s27 = sand.u32 1, %s681_s14   ;;  %s514_s28 = sshll.u32 %s685_s15, 8 }
  0x11   : > { %p770_p11 = pnand %p539_p10, %p890_p5  ;;  %p779_p13 = pnand %p548_p12, %p749_p4 }
  0x12   : > { %s589_s5 = scalar_lea.hbm %s887_s1, 512 }
  0x13   : > { %s898_s29 = scalar_select %p779_p13, 1, 0 }
  0x14   : > { %p590_p0 = scmp.ne.s32.totalorder %s887_s1, %s589_s5  ;;  %p591_p1 = pneg %p770_p11 }
  0x15   : > { %p596_p6 = scmp.lt.u32.totalorder %s589_s5, %s887_s1 }
  0x16   : > { %p592_p2 = pnand %p591_p1, %p590_p0 }
  0x18   : > { %p593_p3 = pneg %p592_p2 }
  0x1a   : > { %p598_p4 = pnand %p596_p6, %p593_p3 }
  0x1c   : > { %601 = shalt.err (!%p598_p4)
}
  0x1d   : > { %s602_s10 = scalar_lea.vmem %s135_s25, 512  ;;  %p610_p5 = scmp.lt.s32.totalorder %s135_s25, %s135_s25 }
  0x1e   : > { %p603_p7 = scmp.ne.s32.totalorder %s135_s25, %s602_s10  ;;  %p611_p8 = scmp.lt.s32.totalorder %s602_s10, %s602_s10 }
  0x20   : > { %p605_p10 = pnand %p603_p7, %p591_p1  ;;  %p612_p9 = por %p611_p8, %p610_p5 }
  0x22   : > { %p606_p12 = pneg %p605_p10 }
  0x24   : > { %p613_p13 = pnand %p612_p9, %p606_p12 }
  0x26   : > { %616 = shalt.err (!%p613_p13)
}
  0x27   : > { %s688_s11 = smov 128   ;;  %s689_s12 = smov 8  }
  0x28   : > { %542 = dma.hbm_to_vmem [thread:$0]  (!%p770_p11), %s887_s1, 512, %s135_s25, [#allocation5], %s688_s11, %s688_s11, %s689_s12  }
  0x29   : > { %s531_s19 = smul.u32 80, %s148_s27  ;;  %s802_s30 = scalar_lea.hbm %s886_s0, %s514_s28 }
  0x2a   : > { %s806_s6 = scalar_lea.sflag [#allocation3], %s148_s27  ;;  %s617_s26 = scalar_lea.hbm %s802_s30, 1280 }
  0x2b   : > { %s152_s4 = scalar_lea.vmem [#allocation2], %s531_s19  ;;  %p618_p5 = scmp.ne.s32.totalorder %s802_s30, %s617_s26 }
  0x2c   : > { %s159_s5 = sshll.u32 %s152_s4, 4  ;;  %p899_p8 = scmp.ne.s32.totalorder %s898_s29, 0  ;;  %s804_s5 = int_to_ptr.vmem [resolvable:$true] %s159_s5 }
  0x2d   : > { %s622_s7 = scalar_lea.hbm %s886_s0, 2560  ;;  %p623_p0 = scmp.lt.u32.totalorder %s802_s30, %s886_s0 }
  0x2e   : > { %p619_p9 = pneg %p899_p8  ;;  %p624_p1 = scmp.lt.u32.totalorder %s622_s7, %s617_s26 }
  0x2f   : > { %p626_p3 = scmp.lt.u32.totalorder %s617_s26, %s802_s30 }
  0x30   : > { %p620_p11 = pnand %p619_p9, %p618_p5  ;;  %p625_p2 = por %p624_p1, %p623_p0 }
  0x32   : > { %p621_p13 = pneg %p620_p11  ;;  %p627_p6 = por %p626_p3, %p625_p2 }
  0x34   : > { %p628_p4 = pnand %p627_p6, %p621_p13 }
  0x36   : > { %631 = shalt.err (!%p628_p4)
}
  0x37   : > { %s632_s27 = scalar_lea.vmem %s804_s5, 1280  ;;  %s690_s10 = smov [#allocation2]  }
  0x38   : > { %p633_p7 = scmp.ne.s32.totalorder %s804_s5, %s632_s27  ;;  %s637_s11 = sshll.u32 %s690_s10, 4  ;;  %s638_s11 = int_to_ptr.vmem [resolvable:$false] %s637_s11 }
  0x39   : > { %s639_s12 = scalar_lea.vmem %s638_s11, 2560  ;;  %p640_p5 = scmp.lt.s32.totalorder %s804_s5, %s638_s11 }
  0x3a   : > { %p635_p10 = pnand %p633_p7, %p619_p9  ;;  %p641_p11 = scmp.lt.s32.totalorder %s639_s12, %s632_s27 }
  0x3c   : > { %p636_p12 = pneg %p635_p10  ;;  %p642_p0 = por %p641_p11, %p640_p5 }
  0x3e   : > { %p643_p1 = pnand %p642_p0, %p636_p12 }
  0x40   : > { %646 = shalt.err (!%p643_p1)
}
  0x41   : > { %s691_s15 = smov 512   ;;  %s692_s18 = smov 256  }
  0x42   : > { %s693_s19 = smov 16   ;;  %p900_p9 = scmp.ne.s32.totalorder %s896_s23, 0 }
  0x43   : > { %546 = dma.hbm_to_vmem [thread:$0]  (!%p899_p8), %s802_s30, 1280, %s804_s5, %s806_s6, %s691_s15, %s692_s18, %s693_s19  }
  0x44   : > { %171 = sbr.rel (%p900_p9) target bundleno = 462 (0x1ce), region = 28  ;;  %s173_s21 = sand.u32 (!%p900_p9), 1, %s677_s13  }
  0x45   : > { %s532_s24 = smul.u32 (!%p900_p9), 80, %s173_s21  ;;  %s174_s4 = scalar_lea.sflag (!%p900_p9), [#allocation3], %s173_s21 }
  0x46   : > { %p901_p13 = scmp.ne.s32.totalorder (!%p900_p9), %s895_s22, 0 }
  0x47   : > { %s837_s26 = scalar_lea.vmem (!%p900_p9), [#allocation2], %s532_s24 }
  0x4b   : > { %664 = dma.done.wait (%p901_p13), %s174_s4, 1280  }
  0x4c   : > { %666 = vsyncadd (%p901_p13), %s174_s4, 4294966016  ;;  %p902_p2 = scmp.eq.s32.totalorder %s734_s16, 0 }
  0x4e   : > { %668 = dma.done.wait (%p902_p2), [#allocation5], 512   ;;  %p903_p8 = pmov %p902_p2 }
  0x4f   : > { %v694_v0 = vmov 0.0   ;;  %v225_v1 = vld [vmem:[%s837_s26 + $0x8] sm:$0xff]  ;;  %v227_v2 = vld [vmem:[%s837_s26 + $0x18] sm:$0xff]  ;;  %v224_v3 = vld [vmem:[%s837_s26] sm:$0xff]  ;;  %vm247_vm0 = vcmask 1043456   ;;  %vm234_vm1 = vcmask 293888  }
  0x50   : > { %670 = vsyncadd (%p903_p8), [#allocation5], 4294966784  ;;  %318 = vmatprep.mubr.f32.mxu0 %v694_v0  ;;  %330 = vmatprep.mubr.f32.mxu1 %v694_v0  ;;  %v517_v4 = vpack.c.bf16 %v227_v2, %v225_v1  ;;  %v226_v5 = vld [vmem:[%s837_s26 + $0x10] sm:$0xff]  ;;  %v229_v6 = vld [vmem:[%s837_s26 + $0x28] sm:$0xff]  ;;  %p210_p3 = scmp.lt.s32.totalorder %s734_s16, 1  ;;  %vm355_vm2 = vcmask 7168  }
  0x51   : > { %v231_v7 = vld [vmem:[%s837_s26 + $0x38] sm:$0xff]  ;;  %v519_v8 = vpack.c.bf16 %v226_v5, %v224_v3  ;;  %v228_v10 = vld [vmem:[%s837_s26 + $0x20] sm:$0xff]  ;;  %v230_v11 = vld [vmem:[%s837_s26 + $0x30] sm:$0xff] }
  0x52   : > { %v521_v9 = vpack.c.bf16 %v231_v7, %v229_v6  ;;  %518 = vmatprep.subr.bf16.mxu0 %v517_v4  ;;  %525 = vmatprep.subr.bf16.mxu1 %v517_v4  ;;  %v523_v12 = vpack.c.bf16 %v230_v11, %v228_v10  ;;  %v233_v13 = vld [vmem:[%s837_s26 + $0x48] sm:$0xf]  ;;  %v232_v14 = vld [vmem:[%s837_s26 + $0x40] sm:$0xf]  ;;  %s909_s16 = smov (!%p210_p3, %s734_s16), 1 }
  0x53   : > { %520 = vmatpush1.bf16.msra.mxu0 %v519_v8  ;;  %528 = vmatpush1.bf16.msra.mxu1 %v519_v8  ;;  %v220_v15 = vld [vmem:[#allocation4] sm:$0xff]  ;;  %v222_v16 = vld [vmem:[#allocation4 + $0x10] sm:$0xff]  ;;  %v223_v17 = vld [vmem:[#allocation4 + $0x18] sm:$0xff]  ;;  %s515_s22 = sshll.u32 %s909_s16, 5 }
  0x54   : > { %522 = vmatprep.subr.bf16.mxu0 %v521_v9  ;;  %526 = vmatprep.subr.bf16.mxu1 %v521_v9  ;;  %v221_v18 = vld [vmem:[#allocation4 + $0x8] sm:$0xff]  ;;  %s214_s30 = scalar_lea.vmem %s888_s2, %s515_s22  ;;  %s219_s25 = scalar_lea.vmem %s889_s3, %s515_s22 }
  0x57   : > { %524 = vmatpush1.bf16.msra.mxu0 %v523_v12  ;;  %529 = vmatpush1.bf16.msra.mxu1 %v523_v12 }
  0x58   : > { %506 = vmatprep.subr.msk.mxu0 %vm247_vm0, %v233_v13  ;;  %527 = vmatprep.subr.msk.mxu1 %vm247_vm0, %v233_v13 }
  0x5b   : > { %507 = vmatpush1.msk.msra.mxu0 %vm247_vm0, %v232_v14  ;;  %530 = vmatpush1.msk.msra.mxu1 %vm247_vm0, %v232_v14 }
  0x5c   : > { %508 = vmatmul.mubr.msk.f32.vlgmr.msra.gmra.mrb[0].mxu0 %vm234_vm1, %v220_v15  ;;  %510 = vmatmul.mubr.msk.f32.vlgmr.msra.gmra.mrb[0].mxu1 %vm234_vm1, %v222_v16 }
  0x5d   : > { %336 = vmatprep.mubr.f32.mxu1 %v694_v0  ;;  %324 = vmatprep.mubr.f32.mxu0 %v694_v0 }
  0x60   : > { %511 = vmatmul.mubr.msk.f32.gmra.mrb[2].mxu1 %vm234_vm1, %v223_v17  ;;  %509 = vmatmul.mubr.msk.f32.gmra.mrb[2].mxu0 %vm234_vm1, %v221_v18 }
 0x12f   : > { %v320_v19 = vpop.f32.mrb[0].mxu0  ;;  %v332_v20 = vpop.f32.mrb[0].mxu1 }
 0x130   : > { %v360_v21 = vmul.f32 %v320_v19, %v320_v19  ;;  %v364_v22 = vmul.f32 %v332_v20, %v332_v20  ;;  %v322_v23 = vpop.f32.mrb[1].mxu0  ;;  %v334_v24 = vpop.f32.mrb[1].mxu1 }
 0x131   : > { %v361_v25 = vmul.f32 %v322_v23, %v322_v23  ;;  %v365_v26 = vmul.f32 %v334_v24, %v334_v24  ;;  %v349_v27 = vadd.f32 %v334_v24, %v332_v20  ;;  %v343_v28 = vadd.f32 %v322_v23, %v320_v19 }
 0x133   : > { %350 = vadd.xlane.f32.xlu1 %v349_v27  ;;  %v338_v29 = vpop.f32.mrb[2].mxu1  ;;  %344 = vadd.xlane.f32.xlu0 %v343_v28  ;;  %v326_v30 = vpop.f32.mrb[2].mxu0  ;;  %v368_v31 = vadd.f32 %v361_v25, %v360_v21  ;;  %v374_v32 = vadd.f32 %v365_v26, %v364_v22 }
 0x134   : > { %v366_v33 = vmul.f32 %v338_v29, %v338_v29  ;;  %v362_v34 = vmul.f32 %v326_v30, %v326_v30  ;;  %v340_v35 = vpop.f32.mrb[3].mxu1  ;;  %v328_v36 = vpop.f32.mrb[3].mxu0 }
 0x135   : > { %v352_v37 = vadd.f32 %v340_v35, %v338_v29  ;;  %v367_v38 = vmul.f32 %v340_v35, %v340_v35  ;;  %v346_v39 = vadd.f32 %v328_v36, %v326_v30  ;;  %v363_v40 = vmul.f32 %v328_v36, %v328_v36 }
 0x137   : > { %353 = vadd.xlane.f32.xlu1 %v352_v37  ;;  %369 = vadd.xlane.f32.xlu0 %v368_v31  ;;  %v371_v41 = vadd.f32 %v363_v40, %v362_v34  ;;  %v377_v42 = vadd.f32 %v367_v38, %v366_v33 }
 0x13b   : > { %372 = vadd.xlane.f32.xlu1 %v371_v41  ;;  %347 = vadd.xlane.f32.xlu0 %v346_v39 }
 0x13f   : > { %378 = vadd.xlane.f32.xlu1 %v377_v42  ;;  %375 = vadd.xlane.f32.xlu0 %v374_v32 }
 0x1c0   : > { %v351_v43 = vpop.xlane.xlu1 %350  ;;  %v345_v44 = vpop.xlane.xlu0 %344 }
 0x1c1   : > { %358 = vst.msk [vmem:[%s214_s30 + $0x10] sm:$0xff] %vm355_vm2, %v351_v43  ;;  %356 = vst.msk [vmem:[%s214_s30] sm:$0xff] %vm355_vm2, %v345_v44 }
 0x1c4   : > { %v354_v45 = vpop.xlane.xlu1 %353  ;;  %v370_v46 = vpop.xlane.xlu0 %369 }
 0x1c5   : > { %359 = vst.msk [vmem:[%s214_s30 + $0x18] sm:$0xff] %vm355_vm2, %v354_v45  ;;  %380 = vst.msk [vmem:[%s219_s25] sm:$0xff] %vm355_vm2, %v370_v46 }
 0x1c8   : > { %v373_v47 = vpop.xlane.xlu1 %372  ;;  %v348_v48 = vpop.xlane.xlu0 %347 }
 0x1c9   : > { %381 = vst.msk [vmem:[%s219_s25 + $0x8] sm:$0xff] %vm355_vm2, %v373_v47  ;;  %357 = vst.msk [vmem:[%s214_s30 + $0x8] sm:$0xff] %vm355_vm2, %v348_v48 }
 0x1cc   : > { %v379_v49 = vpop.xlane.xlu1 %378  ;;  %v376_v50 = vpop.xlane.xlu0 %375 }
 0x1cd   : > { %383 = vst.msk [vmem:[%s219_s25 + $0x18] sm:$0xff] %vm355_vm2, %v379_v49  ;;  %382 = vst.msk [vmem:[%s219_s25 + $0x10] sm:$0xff] %vm355_vm2, %v376_v50 }
 0x1ce PF: > { %p15_p6 = scmp.ge.s32.totalorder %s737_s17, 4   ;;  %s904_s12 = smov %s677_s13 }
 0x1cf   : > { %s905_s13 = smov %s681_s14  ;;  %s906_s14 = smov %s747_s20 }
 0x1d0   : > { %s907_s15 = smov %s737_s17  ;;  %17 = sbr.rel (!%p15_p6) target bundleno = 4 (0x4), region = 84 }
 0x1d7   :  { %421 = vsyncpa [#allocation3], 1 }
 0x1d8   :  { %423 = vsyncpa [#allocation3 + $0x1], 1 }
 0x1d9   :  { %424 = vsyncpa [#allocation5], 1 }

</bundles_post_ra>
